<compile_context>
chip_gen: v5e
topology: v5e:2x2
jax: 0.10.0
libtpu: 0.0.40
codegen_flags: <defaults>
</compile_context>

<pallas_src>
import jax
import jax.numpy as jnp
from jax.experimental import pallas as pl
from jax.experimental.pallas import tpu as pltpu

D = 32          # model size (idim == odim)
H = 4           # attention heads
DK = D // H     # per-head dim
FF = 64         # feed-forward hidden units
EPS = 1e-12     # espnet LayerNorm eps
VW = max(3 * D, FF, D)   # packed small-vector row width


def _layernorm(x, g, b):
    mu = jnp.mean(x, axis=-1, keepdims=True)
    var = jnp.mean((x - mu) ** 2, axis=-1, keepdims=True)
    return (x - mu) * jax.lax.rsqrt(var + EPS) * g + b


def decoder_layer_kernel(x_ref, mask_ref, wbig_ref, w2_ref, vec_ref, out_ref):
    BT, L, _ = mask_ref.shape          # static
    x = x_ref[...]                     # (BT*L, D)

    # ---- unpack packed parameters (static slices, no extra DMAs) ----
    V = vec_ref[...]                   # (8, VW)
    n1w, n1b = V[0:1, :D], V[1:2, :D]
    n2w, n2b = V[2:3, :D], V[3:4, :D]
    bqkv = V[4:5, :3 * D]
    bo = V[5:6, :D]
    b1 = V[6:7, :FF]
    b2 = V[7:8, :D]

    W = wbig_ref[...]                  # (D, 3D + D + FF)
    Wqkv = W[:, 0:3 * D]
    Wo = W[:, 3 * D:4 * D]
    W1 = W[:, 4 * D:4 * D + FF]
    W2 = w2_ref[...]                   # (FF, D)

    # ---------- self-attention block (pre-norm + residual) ----------
    xn = _layernorm(x, n1w, n1b)
    qkv = jnp.dot(xn, Wqkv, preferred_element_type=jnp.float32) + bqkv   # (BT*L, 3D)

    scale = jnp.float32(1.0 / (DK ** 0.5))
    neg = jnp.float32(-1e30)
    mask = mask_ref[...]               # (BT, L, L), 1.0 keep / 0.0 masked

    ctx_rows = []
    for b in range(BT):                # static loops: BT, H are small
        qb = qkv[b * L:(b + 1) * L, 0:D]
        kb = qkv[b * L:(b + 1) * L, D:2 * D]
        vb = qkv[b * L:(b + 1) * L, 2 * D:3 * D]
        keep = mask[b] > 0.0           # hoisted out of the head loop
        heads = []
        for h in range(H):
            qh = qb[:, h * DK:(h + 1) * DK]
            kh = kb[:, h * DK:(h + 1) * DK]
            vh = vb[:, h * DK:(h + 1) * DK]
            s = jnp.dot(qh, kh.T, preferred_element_type=jnp.float32) * scale
            s = jnp.where(keep, s, neg)                  # masked_fill(min_value)
            s = s - jnp.max(s, axis=-1, keepdims=True)
            p = jnp.exp(s)
            denom = jnp.sum(p, axis=-1, keepdims=True)
            r = pl.reciprocal(denom, approx=True)        # EUP vrcp
            r = r * (2.0 - denom * r)                    # one Newton step -> ~f32
            p = p * r
            p = jnp.where(keep, p, 0.0)                  # masked_fill(0.0)
            heads.append(jnp.dot(p, vh, preferred_element_type=jnp.float32))
        ctx_rows.append(jnp.concatenate(heads, axis=-1))  # (L, D)
    ctx = jnp.concatenate(ctx_rows, axis=0)               # (BT*L, D)

    # single output projection over all heads / batch rows
    x = x + jnp.dot(ctx, Wo, preferred_element_type=jnp.float32) + bo

    # ---------- feed-forward block (pre-norm + residual) ----------
    xn2 = _layernorm(x, n2w, n2b)
    h1 = jnp.maximum(jnp.dot(xn2, W1, preferred_element_type=jnp.float32) + b1, 0.0)
    ff = jnp.dot(h1, W2, preferred_element_type=jnp.float32) + b2

    out_ref[...] = (x + ff).astype(out_ref.dtype)


def _pack_params(p):
    """Pack 16 small arrays into {W_big (D, 3D+D+FF), W2 (FF, D), vec (8, VW)}."""
    wqkv = jnp.concatenate([p["wq"], p["wk"], p["wv"]], axis=1)      # (D, 3D)
    wbig = jnp.concatenate([wqkv, p["wo"], p["w1"]], axis=1)         # (D, 3D+D+FF)
    bqkv = jnp.concatenate([p["bq"], p["bk"], p["bv"]], axis=1)      # (1, 3D)

    def row(v):
        v = jnp.asarray(v, jnp.float32).reshape(1, -1)
        return jnp.pad(v, ((0, 0), (0, VW - v.shape[1])))

    vec = jnp.concatenate(
        [row(p["n1w"]), row(p["n1b"]), row(p["n2w"]), row(p["n2b"]),
         row(bqkv), row(p["bo"]), row(p["b1"]), row(p["b2"])], axis=0)  # (8, VW)
    return wbig, p["w2"], vec


def decoder_layer(tgt, tgt_mask, params, batch_tiles=None):
    """Pallas DecoderLayer forward (cache=None). Returns (tgt_out, tgt_mask)."""
    B, L, Dm = tgt.shape
    assert Dm == D
    if batch_tiles is None:
        # one fat step for small batches; 2 parallel tiles when B is large enough
        # (v7x megacore sharding across its 2 TensorCores).
        batch_tiles = 2 if (B >= 8 and B % 2 == 0) else 1
    assert B % batch_tiles == 0
    BT = B // batch_tiles

    wbig, w2, vec = _pack_params(params)
    x2 = tgt.reshape(B * L, Dm)                    # 2-D view: fatter vreg tiles
    mask = tgt_mask.astype(jnp.float32)

    out2 = pl.pallas_call(
        decoder_layer_kernel,
        out_shape=jax.ShapeDtypeStruct((B * L, Dm), tgt.dtype),
        grid=(batch_tiles,),
        in_specs=[
            pl.BlockSpec((BT * L, Dm), lambda i: (i, 0)),
            pl.BlockSpec((BT, L, L), lambda i: (i, 0, 0)),
            pl.BlockSpec(wbig.shape, lambda i: (0, 0)),
            pl.BlockSpec(w2.shape, lambda i: (0, 0)),
            pl.BlockSpec(vec.shape, lambda i: (0, 0)),
        ],
        out_specs=pl.BlockSpec((BT * L, Dm), lambda i: (i, 0)),
        compiler_params=pltpu.CompilerParams(dimension_semantics=("parallel",)),
    )(x2, mask, wbig, w2, vec)
    return out2.reshape(B, L, Dm), tgt_mask


def _reference(tgt, mask, p):
    """Pure-JAX reference for correctness checking."""
    def ln(x, g, b):
        mu = jnp.mean(x, -1, keepdims=True)
        var = jnp.mean((x - mu) ** 2, -1, keepdims=True)
        return (x - mu) / jnp.sqrt(var + EPS) * g + b

    B, L, _ = tgt.shape
    xn = ln(tgt, p["n1w"][0], p["n1b"][0])
    q = xn @ p["wq"] + p["bq"][0]
    k = xn @ p["wk"] + p["bk"][0]
    v = xn @ p["wv"] + p["bv"][0]
    q = q.reshape(B, L, H, DK).transpose(0, 2, 1, 3)
    k = k.reshape(B, L, H, DK).transpose(0, 2, 1, 3)
    v = v.reshape(B, L, H, DK).transpose(0, 2, 1, 3)
    s = jnp.einsum("bhqd,bhkd->bhqk", q, k) / (DK ** 0.5)
    m = (mask[:, None, :, :] > 0)
    s = jnp.where(m, s, -1e30)
    a = jax.nn.softmax(s, axis=-1)
    a = jnp.where(m, a, 0.0)
    ctx = jnp.einsum("bhqk,bhkd->bhqd", a, v).transpose(0, 2, 1, 3).reshape(B, L, D)
    x = tgt + ctx @ p["wo"] + p["bo"][0]
    xn2 = ln(x, p["n2w"][0], p["n2b"][0])
    ff = jnp.maximum(xn2 @ p["w1"] + p["b1"][0], 0.0) @ p["w2"] + p["b2"][0]
    return x + ff


def _init_params(key):
    ks = jax.random.split(key, 16)
    def w(k, shape, scale=0.1):
        return (scale * jax.random.normal(k, shape)).astype(jnp.float32)
    return {
        "n1w": jnp.ones((1, D), jnp.float32), "n1b": jnp.zeros((1, D), jnp.float32),
        "n2w": jnp.ones((1, D), jnp.float32), "n2b": jnp.zeros((1, D), jnp.float32),
        "wq": w(ks[0], (D, D)), "bq": w(ks[1], (1, D)),
        "wk": w(ks[2], (D, D)), "bk": w(ks[3], (1, D)),
        "wv": w(ks[4], (D, D)), "bv": w(ks[5], (1, D)),
        "wo": w(ks[6], (D, D)), "bo": w(ks[7], (1, D)),
        "w1": w(ks[8], (D, FF)), "b1": w(ks[9], (1, FF)),
        "w2": w(ks[10], (FF, D)), "b2": w(ks[11], (1, D)),
    }


if __name__ == "__main__":
    B, L = 2, 8
    key = jax.random.PRNGKey(0)
    k_x, k_p = jax.random.split(key)

    tgt = jax.random.normal(k_x, (B, L, D), dtype=jnp.float32)
    # causal decoder mask (B, L, L): 1.0 = attend, 0.0 = masked
    causal = jnp.tril(jnp.ones((L, L), jnp.float32))
    tgt_mask = jnp.broadcast_to(causal, (B, L, L)).astype(jnp.float32)

    params = _init_params(k_p)

    out, out_mask = decoder_layer(tgt, tgt_mask, params)
    out = jax.block_until_ready(out)

    ref = _reference(tgt, tgt_mask, params)
    assert out.shape == (B, L, D)
    assert jnp.allclose(out, ref, atol=1e-4, rtol=1e-4), (
        float(jnp.max(jnp.abs(out - ref))))

    print("KERNEL_OK")
</pallas_src>

<mosaic_0001>
module attributes {stable_mosaic.version = 11 : i64} {
  func.func @decoder_layer_kernel(%arg0: i32, %arg1: memref<16x32xf32, #tpu.memory_space<vmem>>, %arg2: memref<2x8x8xf32, #tpu.memory_space<vmem>>, %arg3: memref<32x192xf32, #tpu.memory_space<vmem>>, %arg4: memref<64x32xf32, #tpu.memory_space<vmem>>, %arg5: memref<8x96xf32, #tpu.memory_space<vmem>>, %arg6: memref<16x32xf32, #tpu.memory_space<vmem>>) attributes {dimension_semantics = [#tpu.dimension_semantics<parallel>], iteration_bounds = array<i64: 1>, scalar_prefetch = 0 : i64, scratch_operands = 0 : i64, tpu.core_type = #tpu.core_type<tc>, window_params = [{transform_indices = @transform_0, window_bounds = array<i64: 16, 32>}, {transform_indices = @transform_1, window_bounds = array<i64: 2, 8, 8>}, {pipeline_mode = #tpu.pipeline_mode<synchronous>, transform_indices = @transform_2, window_bounds = array<i64: 32, 192>}, {pipeline_mode = #tpu.pipeline_mode<synchronous>, transform_indices = @transform_3, window_bounds = array<i64: 64, 32>}, {pipeline_mode = #tpu.pipeline_mode<synchronous>, transform_indices = @transform_4, window_bounds = array<i64: 8, 96>}, {transform_indices = @transform_5, window_bounds = array<i64: 16, 32>}]} {
    %c0 = arith.constant 0 : index
    %c0_0 = arith.constant 0 : index
    %0 = vector.load %arg1[%c0, %c0_0] : memref<16x32xf32, #tpu.memory_space<vmem>>, vector<16x32xf32>
    %c0_1 = arith.constant 0 : index
    %c0_2 = arith.constant 0 : index
    %1 = vector.load %arg5[%c0_1, %c0_2] : memref<8x96xf32, #tpu.memory_space<vmem>>, vector<8x96xf32>
    %2 = vector.extract_strided_slice %1 {offsets = [0, 0], sizes = [1, 32], strides = [1, 1]} : vector<8x96xf32> to vector<1x32xf32>
    %3 = vector.extract_strided_slice %1 {offsets = [1, 0], sizes = [1, 32], strides = [1, 1]} : vector<8x96xf32> to vector<1x32xf32>
    %4 = vector.extract_strided_slice %1 {offsets = [2, 0], sizes = [1, 32], strides = [1, 1]} : vector<8x96xf32> to vector<1x32xf32>
    %5 = vector.extract_strided_slice %1 {offsets = [3, 0], sizes = [1, 32], strides = [1, 1]} : vector<8x96xf32> to vector<1x32xf32>
    %6 = vector.extract_strided_slice %1 {offsets = [4, 0], sizes = [1, 96], strides = [1, 1]} : vector<8x96xf32> to vector<1x96xf32>
    %7 = vector.extract_strided_slice %1 {offsets = [5, 0], sizes = [1, 32], strides = [1, 1]} : vector<8x96xf32> to vector<1x32xf32>
    %8 = vector.extract_strided_slice %1 {offsets = [6, 0], sizes = [1, 64], strides = [1, 1]} : vector<8x96xf32> to vector<1x64xf32>
    %9 = vector.extract_strided_slice %1 {offsets = [7, 0], sizes = [1, 32], strides = [1, 1]} : vector<8x96xf32> to vector<1x32xf32>
    %c0_3 = arith.constant 0 : index
    %c0_4 = arith.constant 0 : index
    %10 = vector.load %arg3[%c0_3, %c0_4] : memref<32x192xf32, #tpu.memory_space<vmem>>, vector<32x192xf32>
    %11 = vector.extract_strided_slice %10 {offsets = [0, 0], sizes = [32, 96], strides = [1, 1]} : vector<32x192xf32> to vector<32x96xf32>
    %12 = vector.extract_strided_slice %10 {offsets = [0, 96], sizes = [32, 32], strides = [1, 1]} : vector<32x192xf32> to vector<32x32xf32>
    %13 = vector.extract_strided_slice %10 {offsets = [0, 128], sizes = [32, 64], strides = [1, 1]} : vector<32x192xf32> to vector<32x64xf32>
    %c0_5 = arith.constant 0 : index
    %c0_6 = arith.constant 0 : index
    %14 = vector.load %arg4[%c0_5, %c0_6] : memref<64x32xf32, #tpu.memory_space<vmem>>, vector<64x32xf32>
    %cst = arith.constant dense<0.000000e+00> : vector<16xf32>
    %15 = vector.multi_reduction <add>, %0, %cst [1] : vector<16x32xf32> to vector<16xf32>
    %16 = vector.shape_cast %15 : vector<16xf32> to vector<16x1xf32>
    %cst_7 = arith.constant 3.200000e+01 : f32
    %17 = vector.broadcast %cst_7 : f32 to vector<16x1xf32>
    %18 = arith.divf %16, %17 : vector<16x1xf32>
    %19 = vector.broadcast %18 : vector<16x1xf32> to vector<16x32xf32>
    %20 = arith.subf %0, %19 : vector<16x32xf32>
    %21 = arith.mulf %20, %20 : vector<16x32xf32>
    %cst_8 = arith.constant dense<0.000000e+00> : vector<16xf32>
    %22 = vector.multi_reduction <add>, %21, %cst_8 [1] : vector<16x32xf32> to vector<16xf32>
    %23 = vector.shape_cast %22 : vector<16xf32> to vector<16x1xf32>
    %cst_9 = arith.constant 3.200000e+01 : f32
    %24 = vector.broadcast %cst_9 : f32 to vector<16x1xf32>
    %25 = arith.divf %23, %24 : vector<16x1xf32>
    %26 = vector.broadcast %18 : vector<16x1xf32> to vector<16x32xf32>
    %27 = arith.subf %0, %26 : vector<16x32xf32>
    %cst_10 = arith.constant 9.99999996E-13 : f32
    %28 = vector.broadcast %cst_10 : f32 to vector<16x1xf32>
    %29 = arith.addf %25, %28 : vector<16x1xf32>
    %30 = math.rsqrt %29 : vector<16x1xf32>
    %31 = vector.broadcast %30 : vector<16x1xf32> to vector<16x32xf32>
    %32 = arith.mulf %27, %31 : vector<16x32xf32>
    %33 = vector.broadcast %2 : vector<1x32xf32> to vector<16x32xf32>
    %34 = arith.mulf %32, %33 : vector<16x32xf32>
    %35 = vector.broadcast %3 : vector<1x32xf32> to vector<16x32xf32>
    %36 = arith.addf %34, %35 : vector<16x32xf32>
    %cst_11 = arith.constant dense<0.000000e+00> : vector<16x96xf32>
    %37 = tpu.matmul %36, %11, %cst_11 {dimension_numbers = #tpu.dot_dimension_numbers<[1], [0], [0], [1], [0, 0, 1, 1], [], []>} : vector<16x32xf32>, vector<32x96xf32>, vector<16x96xf32> -> vector<16x96xf32>
    %38 = vector.broadcast %6 : vector<1x96xf32> to vector<16x96xf32>
    %39 = arith.addf %37, %38 : vector<16x96xf32>
    %c0_12 = arith.constant 0 : index
    %c0_13 = arith.constant 0 : index
    %c0_14 = arith.constant 0 : index
    %40 = vector.load %arg2[%c0_12, %c0_13, %c0_14] : memref<2x8x8xf32, #tpu.memory_space<vmem>>, vector<2x8x8xf32>
    %41 = vector.extract_strided_slice %39 {offsets = [0, 0], sizes = [8, 32], strides = [1, 1]} : vector<16x96xf32> to vector<8x32xf32>
    %42 = vector.extract_strided_slice %39 {offsets = [0, 32], sizes = [8, 32], strides = [1, 1]} : vector<16x96xf32> to vector<8x32xf32>
    %43 = vector.extract_strided_slice %39 {offsets = [0, 64], sizes = [8, 32], strides = [1, 1]} : vector<16x96xf32> to vector<8x32xf32>
    %44 = vector.extract_strided_slice %40 {offsets = [0, 0, 0], sizes = [1, 8, 8], strides = [1, 1, 1]} : vector<2x8x8xf32> to vector<1x8x8xf32>
    %45 = vector.shape_cast %44 : vector<1x8x8xf32> to vector<8x8xf32>
    %cst_15 = arith.constant 0.000000e+00 : f32
    %46 = vector.broadcast %cst_15 : f32 to vector<8x8xf32>
    %47 = arith.cmpf ogt, %45, %46 : vector<8x8xf32>
    %48 = vector.extract_strided_slice %41 {offsets = [0, 0], sizes = [8, 8], strides = [1, 1]} : vector<8x32xf32> to vector<8x8xf32>
    %49 = vector.extract_strided_slice %42 {offsets = [0, 0], sizes = [8, 8], strides = [1, 1]} : vector<8x32xf32> to vector<8x8xf32>
    %50 = vector.extract_strided_slice %43 {offsets = [0, 0], sizes = [8, 8], strides = [1, 1]} : vector<8x32xf32> to vector<8x8xf32>
    %51 = tpu.transpose %49, [1, 0] : vector<8x8xf32> -> vector<8x8xf32>
    %cst_16 = arith.constant dense<0.000000e+00> : vector<8x8xf32>
    %52 = tpu.matmul %48, %51, %cst_16 {dimension_numbers = #tpu.dot_dimension_numbers<[1], [0], [0], [1], [0, 0, 1, 1], [], []>} : vector<8x8xf32>, vector<8x8xf32>, vector<8x8xf32> -> vector<8x8xf32>
    %cst_17 = arith.constant 0.353553385 : f32
    %53 = vector.broadcast %cst_17 : f32 to vector<8x8xf32>
    %54 = arith.mulf %52, %53 : vector<8x8xf32>
    %cst_18 = arith.constant -1.000000e+30 : f32
    %55 = vector.broadcast %cst_18 : f32 to vector<8x8xf32>
    %56 = arith.select %47, %54, %55 : vector<8x8xi1>, vector<8x8xf32>
    %cst_19 = arith.constant dense<0xFF800000> : vector<8xf32>
    %57 = vector.multi_reduction <maximumf>, %56, %cst_19 [1] : vector<8x8xf32> to vector<8xf32>
    %58 = vector.shape_cast %57 : vector<8xf32> to vector<8x1xf32>
    %59 = vector.broadcast %58 : vector<8x1xf32> to vector<8x8xf32>
    %60 = arith.subf %56, %59 : vector<8x8xf32>
    %61 = math.exp %60 : vector<8x8xf32>
    %cst_20 = arith.constant dense<0.000000e+00> : vector<8xf32>
    %62 = vector.multi_reduction <add>, %61, %cst_20 [1] : vector<8x8xf32> to vector<8xf32>
    %63 = vector.shape_cast %62 : vector<8xf32> to vector<8x1xf32>
    %64 = tpu.reciprocal %63 {approx = true} : vector<8x1xf32> -> vector<8x1xf32>
    %65 = arith.mulf %63, %64 : vector<8x1xf32>
    %cst_21 = arith.constant 2.000000e+00 : f32
    %66 = vector.broadcast %cst_21 : f32 to vector<8x1xf32>
    %67 = arith.subf %66, %65 : vector<8x1xf32>
    %68 = arith.mulf %64, %67 : vector<8x1xf32>
    %69 = vector.broadcast %68 : vector<8x1xf32> to vector<8x8xf32>
    %70 = arith.mulf %61, %69 : vector<8x8xf32>
    %cst_22 = arith.constant 0.000000e+00 : f32
    %71 = vector.broadcast %cst_22 : f32 to vector<8x8xf32>
    %72 = arith.select %47, %70, %71 : vector<8x8xi1>, vector<8x8xf32>
    %cst_23 = arith.constant dense<0.000000e+00> : vector<8x8xf32>
    %73 = tpu.matmul %72, %50, %cst_23 {dimension_numbers = #tpu.dot_dimension_numbers<[1], [0], [0], [1], [0, 0, 1, 1], [], []>} : vector<8x8xf32>, vector<8x8xf32>, vector<8x8xf32> -> vector<8x8xf32>
    %74 = vector.extract_strided_slice %41 {offsets = [0, 8], sizes = [8, 8], strides = [1, 1]} : vector<8x32xf32> to vector<8x8xf32>
    %75 = vector.extract_strided_slice %42 {offsets = [0, 8], sizes = [8, 8], strides = [1, 1]} : vector<8x32xf32> to vector<8x8xf32>
    %76 = vector.extract_strided_slice %43 {offsets = [0, 8], sizes = [8, 8], strides = [1, 1]} : vector<8x32xf32> to vector<8x8xf32>
    %77 = tpu.transpose %75, [1, 0] : vector<8x8xf32> -> vector<8x8xf32>
    %cst_24 = arith.constant dense<0.000000e+00> : vector<8x8xf32>
    %78 = tpu.matmul %74, %77, %cst_24 {dimension_numbers = #tpu.dot_dimension_numbers<[1], [0], [0], [1], [0, 0, 1, 1], [], []>} : vector<8x8xf32>, vector<8x8xf32>, vector<8x8xf32> -> vector<8x8xf32>
    %cst_25 = arith.constant 0.353553385 : f32
    %79 = vector.broadcast %cst_25 : f32 to vector<8x8xf32>
    %80 = arith.mulf %78, %79 : vector<8x8xf32>
    %cst_26 = arith.constant -1.000000e+30 : f32
    %81 = vector.broadcast %cst_26 : f32 to vector<8x8xf32>
    %82 = arith.select %47, %80, %81 : vector<8x8xi1>, vector<8x8xf32>
    %cst_27 = arith.constant dense<0xFF800000> : vector<8xf32>
    %83 = vector.multi_reduction <maximumf>, %82, %cst_27 [1] : vector<8x8xf32> to vector<8xf32>
    %84 = vector.shape_cast %83 : vector<8xf32> to vector<8x1xf32>
    %85 = vector.broadcast %84 : vector<8x1xf32> to vector<8x8xf32>
    %86 = arith.subf %82, %85 : vector<8x8xf32>
    %87 = math.exp %86 : vector<8x8xf32>
    %cst_28 = arith.constant dense<0.000000e+00> : vector<8xf32>
    %88 = vector.multi_reduction <add>, %87, %cst_28 [1] : vector<8x8xf32> to vector<8xf32>
    %89 = vector.shape_cast %88 : vector<8xf32> to vector<8x1xf32>
    %90 = tpu.reciprocal %89 {approx = true} : vector<8x1xf32> -> vector<8x1xf32>
    %91 = arith.mulf %89, %90 : vector<8x1xf32>
    %cst_29 = arith.constant 2.000000e+00 : f32
    %92 = vector.broadcast %cst_29 : f32 to vector<8x1xf32>
    %93 = arith.subf %92, %91 : vector<8x1xf32>
    %94 = arith.mulf %90, %93 : vector<8x1xf32>
    %95 = vector.broadcast %94 : vector<8x1xf32> to vector<8x8xf32>
    %96 = arith.mulf %87, %95 : vector<8x8xf32>
    %cst_30 = arith.constant 0.000000e+00 : f32
    %97 = vector.broadcast %cst_30 : f32 to vector<8x8xf32>
    %98 = arith.select %47, %96, %97 : vector<8x8xi1>, vector<8x8xf32>
    %cst_31 = arith.constant dense<0.000000e+00> : vector<8x8xf32>
    %99 = tpu.matmul %98, %76, %cst_31 {dimension_numbers = #tpu.dot_dimension_numbers<[1], [0], [0], [1], [0, 0, 1, 1], [], []>} : vector<8x8xf32>, vector<8x8xf32>, vector<8x8xf32> -> vector<8x8xf32>
    %100 = vector.extract_strided_slice %41 {offsets = [0, 16], sizes = [8, 8], strides = [1, 1]} : vector<8x32xf32> to vector<8x8xf32>
    %101 = vector.extract_strided_slice %42 {offsets = [0, 16], sizes = [8, 8], strides = [1, 1]} : vector<8x32xf32> to vector<8x8xf32>
    %102 = vector.extract_strided_slice %43 {offsets = [0, 16], sizes = [8, 8], strides = [1, 1]} : vector<8x32xf32> to vector<8x8xf32>
    %103 = tpu.transpose %101, [1, 0] : vector<8x8xf32> -> vector<8x8xf32>
    %cst_32 = arith.constant dense<0.000000e+00> : vector<8x8xf32>
    %104 = tpu.matmul %100, %103, %cst_32 {dimension_numbers = #tpu.dot_dimension_numbers<[1], [0], [0], [1], [0, 0, 1, 1], [], []>} : vector<8x8xf32>, vector<8x8xf32>, vector<8x8xf32> -> vector<8x8xf32>
    %cst_33 = arith.constant 0.353553385 : f32
    %105 = vector.broadcast %cst_33 : f32 to vector<8x8xf32>
    %106 = arith.mulf %104, %105 : vector<8x8xf32>
    %cst_34 = arith.constant -1.000000e+30 : f32
    %107 = vector.broadcast %cst_34 : f32 to vector<8x8xf32>
    %108 = arith.select %47, %106, %107 : vector<8x8xi1>, vector<8x8xf32>
    %cst_35 = arith.constant dense<0xFF800000> : vector<8xf32>
    %109 = vector.multi_reduction <maximumf>, %108, %cst_35 [1] : vector<8x8xf32> to vector<8xf32>
    %110 = vector.shape_cast %109 : vector<8xf32> to vector<8x1xf32>
    %111 = vector.broadcast %110 : vector<8x1xf32> to vector<8x8xf32>
    %112 = arith.subf %108, %111 : vector<8x8xf32>
    %113 = math.exp %112 : vector<8x8xf32>
    %cst_36 = arith.constant dense<0.000000e+00> : vector<8xf32>
    %114 = vector.multi_reduction <add>, %113, %cst_36 [1] : vector<8x8xf32> to vector<8xf32>
    %115 = vector.shape_cast %114 : vector<8xf32> to vector<8x1xf32>
    %116 = tpu.reciprocal %115 {approx = true} : vector<8x1xf32> -> vector<8x1xf32>
    %117 = arith.mulf %115, %116 : vector<8x1xf32>
    %cst_37 = arith.constant 2.000000e+00 : f32
    %118 = vector.broadcast %cst_37 : f32 to vector<8x1xf32>
    %119 = arith.subf %118, %117 : vector<8x1xf32>
    %120 = arith.mulf %116, %119 : vector<8x1xf32>
    %121 = vector.broadcast %120 : vector<8x1xf32> to vector<8x8xf32>
    %122 = arith.mulf %113, %121 : vector<8x8xf32>
    %cst_38 = arith.constant 0.000000e+00 : f32
    %123 = vector.broadcast %cst_38 : f32 to vector<8x8xf32>
    %124 = arith.select %47, %122, %123 : vector<8x8xi1>, vector<8x8xf32>
    %cst_39 = arith.constant dense<0.000000e+00> : vector<8x8xf32>
    %125 = tpu.matmul %124, %102, %cst_39 {dimension_numbers = #tpu.dot_dimension_numbers<[1], [0], [0], [1], [0, 0, 1, 1], [], []>} : vector<8x8xf32>, vector<8x8xf32>, vector<8x8xf32> -> vector<8x8xf32>
    %126 = vector.extract_strided_slice %41 {offsets = [0, 24], sizes = [8, 8], strides = [1, 1]} : vector<8x32xf32> to vector<8x8xf32>
    %127 = vector.extract_strided_slice %42 {offsets = [0, 24], sizes = [8, 8], strides = [1, 1]} : vector<8x32xf32> to vector<8x8xf32>
    %128 = vector.extract_strided_slice %43 {offsets = [0, 24], sizes = [8, 8], strides = [1, 1]} : vector<8x32xf32> to vector<8x8xf32>
    %129 = tpu.transpose %127, [1, 0] : vector<8x8xf32> -> vector<8x8xf32>
    %cst_40 = arith.constant dense<0.000000e+00> : vector<8x8xf32>
    %130 = tpu.matmul %126, %129, %cst_40 {dimension_numbers = #tpu.dot_dimension_numbers<[1], [0], [0], [1], [0, 0, 1, 1], [], []>} : vector<8x8xf32>, vector<8x8xf32>, vector<8x8xf32> -> vector<8x8xf32>
    %cst_41 = arith.constant 0.353553385 : f32
    %131 = vector.broadcast %cst_41 : f32 to vector<8x8xf32>
    %132 = arith.mulf %130, %131 : vector<8x8xf32>
    %cst_42 = arith.constant -1.000000e+30 : f32
    %133 = vector.broadcast %cst_42 : f32 to vector<8x8xf32>
    %134 = arith.select %47, %132, %133 : vector<8x8xi1>, vector<8x8xf32>
    %cst_43 = arith.constant dense<0xFF800000> : vector<8xf32>
    %135 = vector.multi_reduction <maximumf>, %134, %cst_43 [1] : vector<8x8xf32> to vector<8xf32>
    %136 = vector.shape_cast %135 : vector<8xf32> to vector<8x1xf32>
    %137 = vector.broadcast %136 : vector<8x1xf32> to vector<8x8xf32>
    %138 = arith.subf %134, %137 : vector<8x8xf32>
    %139 = math.exp %138 : vector<8x8xf32>
    %cst_44 = arith.constant dense<0.000000e+00> : vector<8xf32>
    %140 = vector.multi_reduction <add>, %139, %cst_44 [1] : vector<8x8xf32> to vector<8xf32>
    %141 = vector.shape_cast %140 : vector<8xf32> to vector<8x1xf32>
    %142 = tpu.reciprocal %141 {approx = true} : vector<8x1xf32> -> vector<8x1xf32>
    %143 = arith.mulf %141, %142 : vector<8x1xf32>
    %cst_45 = arith.constant 2.000000e+00 : f32
    %144 = vector.broadcast %cst_45 : f32 to vector<8x1xf32>
    %145 = arith.subf %144, %143 : vector<8x1xf32>
    %146 = arith.mulf %142, %145 : vector<8x1xf32>
    %147 = vector.broadcast %146 : vector<8x1xf32> to vector<8x8xf32>
    %148 = arith.mulf %139, %147 : vector<8x8xf32>
    %cst_46 = arith.constant 0.000000e+00 : f32
    %149 = vector.broadcast %cst_46 : f32 to vector<8x8xf32>
    %150 = arith.select %47, %148, %149 : vector<8x8xi1>, vector<8x8xf32>
    %cst_47 = arith.constant dense<0.000000e+00> : vector<8x8xf32>
    %151 = tpu.matmul %150, %128, %cst_47 {dimension_numbers = #tpu.dot_dimension_numbers<[1], [0], [0], [1], [0, 0, 1, 1], [], []>} : vector<8x8xf32>, vector<8x8xf32>, vector<8x8xf32> -> vector<8x8xf32>
    %152 = tpu.concatenate %73, %99, %125, %151 in 1 : vector<8x8xf32>, vector<8x8xf32>, vector<8x8xf32>, vector<8x8xf32> -> vector<8x32xf32>
    %153 = vector.extract_strided_slice %39 {offsets = [8, 0], sizes = [8, 32], strides = [1, 1]} : vector<16x96xf32> to vector<8x32xf32>
    %154 = vector.extract_strided_slice %39 {offsets = [8, 32], sizes = [8, 32], strides = [1, 1]} : vector<16x96xf32> to vector<8x32xf32>
    %155 = vector.extract_strided_slice %39 {offsets = [8, 64], sizes = [8, 32], strides = [1, 1]} : vector<16x96xf32> to vector<8x32xf32>
    %156 = vector.extract_strided_slice %40 {offsets = [1, 0, 0], sizes = [1, 8, 8], strides = [1, 1, 1]} : vector<2x8x8xf32> to vector<1x8x8xf32>
    %157 = vector.shape_cast %156 : vector<1x8x8xf32> to vector<8x8xf32>
    %cst_48 = arith.constant 0.000000e+00 : f32
    %158 = vector.broadcast %cst_48 : f32 to vector<8x8xf32>
    %159 = arith.cmpf ogt, %157, %158 : vector<8x8xf32>
    %160 = vector.extract_strided_slice %153 {offsets = [0, 0], sizes = [8, 8], strides = [1, 1]} : vector<8x32xf32> to vector<8x8xf32>
    %161 = vector.extract_strided_slice %154 {offsets = [0, 0], sizes = [8, 8], strides = [1, 1]} : vector<8x32xf32> to vector<8x8xf32>
    %162 = vector.extract_strided_slice %155 {offsets = [0, 0], sizes = [8, 8], strides = [1, 1]} : vector<8x32xf32> to vector<8x8xf32>
    %163 = tpu.transpose %161, [1, 0] : vector<8x8xf32> -> vector<8x8xf32>
    %cst_49 = arith.constant dense<0.000000e+00> : vector<8x8xf32>
    %164 = tpu.matmul %160, %163, %cst_49 {dimension_numbers = #tpu.dot_dimension_numbers<[1], [0], [0], [1], [0, 0, 1, 1], [], []>} : vector<8x8xf32>, vector<8x8xf32>, vector<8x8xf32> -> vector<8x8xf32>
    %cst_50 = arith.constant 0.353553385 : f32
    %165 = vector.broadcast %cst_50 : f32 to vector<8x8xf32>
    %166 = arith.mulf %164, %165 : vector<8x8xf32>
    %cst_51 = arith.constant -1.000000e+30 : f32
    %167 = vector.broadcast %cst_51 : f32 to vector<8x8xf32>
    %168 = arith.select %159, %166, %167 : vector<8x8xi1>, vector<8x8xf32>
    %cst_52 = arith.constant dense<0xFF800000> : vector<8xf32>
    %169 = vector.multi_reduction <maximumf>, %168, %cst_52 [1] : vector<8x8xf32> to vector<8xf32>
    %170 = vector.shape_cast %169 : vector<8xf32> to vector<8x1xf32>
    %171 = vector.broadcast %170 : vector<8x1xf32> to vector<8x8xf32>
    %172 = arith.subf %168, %171 : vector<8x8xf32>
    %173 = math.exp %172 : vector<8x8xf32>
    %cst_53 = arith.constant dense<0.000000e+00> : vector<8xf32>
    %174 = vector.multi_reduction <add>, %173, %cst_53 [1] : vector<8x8xf32> to vector<8xf32>
    %175 = vector.shape_cast %174 : vector<8xf32> to vector<8x1xf32>
    %176 = tpu.reciprocal %175 {approx = true} : vector<8x1xf32> -> vector<8x1xf32>
    %177 = arith.mulf %175, %176 : vector<8x1xf32>
    %cst_54 = arith.constant 2.000000e+00 : f32
    %178 = vector.broadcast %cst_54 : f32 to vector<8x1xf32>
    %179 = arith.subf %178, %177 : vector<8x1xf32>
    %180 = arith.mulf %176, %179 : vector<8x1xf32>
    %181 = vector.broadcast %180 : vector<8x1xf32> to vector<8x8xf32>
    %182 = arith.mulf %173, %181 : vector<8x8xf32>
    %cst_55 = arith.constant 0.000000e+00 : f32
    %183 = vector.broadcast %cst_55 : f32 to vector<8x8xf32>
    %184 = arith.select %159, %182, %183 : vector<8x8xi1>, vector<8x8xf32>
    %cst_56 = arith.constant dense<0.000000e+00> : vector<8x8xf32>
    %185 = tpu.matmul %184, %162, %cst_56 {dimension_numbers = #tpu.dot_dimension_numbers<[1], [0], [0], [1], [0, 0, 1, 1], [], []>} : vector<8x8xf32>, vector<8x8xf32>, vector<8x8xf32> -> vector<8x8xf32>
    %186 = vector.extract_strided_slice %153 {offsets = [0, 8], sizes = [8, 8], strides = [1, 1]} : vector<8x32xf32> to vector<8x8xf32>
    %187 = vector.extract_strided_slice %154 {offsets = [0, 8], sizes = [8, 8], strides = [1, 1]} : vector<8x32xf32> to vector<8x8xf32>
    %188 = vector.extract_strided_slice %155 {offsets = [0, 8], sizes = [8, 8], strides = [1, 1]} : vector<8x32xf32> to vector<8x8xf32>
    %189 = tpu.transpose %187, [1, 0] : vector<8x8xf32> -> vector<8x8xf32>
    %cst_57 = arith.constant dense<0.000000e+00> : vector<8x8xf32>
    %190 = tpu.matmul %186, %189, %cst_57 {dimension_numbers = #tpu.dot_dimension_numbers<[1], [0], [0], [1], [0, 0, 1, 1], [], []>} : vector<8x8xf32>, vector<8x8xf32>, vector<8x8xf32> -> vector<8x8xf32>
    %cst_58 = arith.constant 0.353553385 : f32
    %191 = vector.broadcast %cst_58 : f32 to vector<8x8xf32>
    %192 = arith.mulf %190, %191 : vector<8x8xf32>
    %cst_59 = arith.constant -1.000000e+30 : f32
    %193 = vector.broadcast %cst_59 : f32 to vector<8x8xf32>
    %194 = arith.select %159, %192, %193 : vector<8x8xi1>, vector<8x8xf32>
    %cst_60 = arith.constant dense<0xFF800000> : vector<8xf32>
    %195 = vector.multi_reduction <maximumf>, %194, %cst_60 [1] : vector<8x8xf32> to vector<8xf32>
    %196 = vector.shape_cast %195 : vector<8xf32> to vector<8x1xf32>
    %197 = vector.broadcast %196 : vector<8x1xf32> to vector<8x8xf32>
    %198 = arith.subf %194, %197 : vector<8x8xf32>
    %199 = math.exp %198 : vector<8x8xf32>
    %cst_61 = arith.constant dense<0.000000e+00> : vector<8xf32>
    %200 = vector.multi_reduction <add>, %199, %cst_61 [1] : vector<8x8xf32> to vector<8xf32>
    %201 = vector.shape_cast %200 : vector<8xf32> to vector<8x1xf32>
    %202 = tpu.reciprocal %201 {approx = true} : vector<8x1xf32> -> vector<8x1xf32>
    %203 = arith.mulf %201, %202 : vector<8x1xf32>
    %cst_62 = arith.constant 2.000000e+00 : f32
    %204 = vector.broadcast %cst_62 : f32 to vector<8x1xf32>
    %205 = arith.subf %204, %203 : vector<8x1xf32>
    %206 = arith.mulf %202, %205 : vector<8x1xf32>
    %207 = vector.broadcast %206 : vector<8x1xf32> to vector<8x8xf32>
    %208 = arith.mulf %199, %207 : vector<8x8xf32>
    %cst_63 = arith.constant 0.000000e+00 : f32
    %209 = vector.broadcast %cst_63 : f32 to vector<8x8xf32>
    %210 = arith.select %159, %208, %209 : vector<8x8xi1>, vector<8x8xf32>
    %cst_64 = arith.constant dense<0.000000e+00> : vector<8x8xf32>
    %211 = tpu.matmul %210, %188, %cst_64 {dimension_numbers = #tpu.dot_dimension_numbers<[1], [0], [0], [1], [0, 0, 1, 1], [], []>} : vector<8x8xf32>, vector<8x8xf32>, vector<8x8xf32> -> vector<8x8xf32>
    %212 = vector.extract_strided_slice %153 {offsets = [0, 16], sizes = [8, 8], strides = [1, 1]} : vector<8x32xf32> to vector<8x8xf32>
    %213 = vector.extract_strided_slice %154 {offsets = [0, 16], sizes = [8, 8], strides = [1, 1]} : vector<8x32xf32> to vector<8x8xf32>
    %214 = vector.extract_strided_slice %155 {offsets = [0, 16], sizes = [8, 8], strides = [1, 1]} : vector<8x32xf32> to vector<8x8xf32>
    %215 = tpu.transpose %213, [1, 0] : vector<8x8xf32> -> vector<8x8xf32>
    %cst_65 = arith.constant dense<0.000000e+00> : vector<8x8xf32>
    %216 = tpu.matmul %212, %215, %cst_65 {dimension_numbers = #tpu.dot_dimension_numbers<[1], [0], [0], [1], [0, 0, 1, 1], [], []>} : vector<8x8xf32>, vector<8x8xf32>, vector<8x8xf32> -> vector<8x8xf32>
    %cst_66 = arith.constant 0.353553385 : f32
    %217 = vector.broadcast %cst_66 : f32 to vector<8x8xf32>
    %218 = arith.mulf %216, %217 : vector<8x8xf32>
    %cst_67 = arith.constant -1.000000e+30 : f32
    %219 = vector.broadcast %cst_67 : f32 to vector<8x8xf32>
    %220 = arith.select %159, %218, %219 : vector<8x8xi1>, vector<8x8xf32>
    %cst_68 = arith.constant dense<0xFF800000> : vector<8xf32>
    %221 = vector.multi_reduction <maximumf>, %220, %cst_68 [1] : vector<8x8xf32> to vector<8xf32>
    %222 = vector.shape_cast %221 : vector<8xf32> to vector<8x1xf32>
    %223 = vector.broadcast %222 : vector<8x1xf32> to vector<8x8xf32>
    %224 = arith.subf %220, %223 : vector<8x8xf32>
    %225 = math.exp %224 : vector<8x8xf32>
    %cst_69 = arith.constant dense<0.000000e+00> : vector<8xf32>
    %226 = vector.multi_reduction <add>, %225, %cst_69 [1] : vector<8x8xf32> to vector<8xf32>
    %227 = vector.shape_cast %226 : vector<8xf32> to vector<8x1xf32>
    %228 = tpu.reciprocal %227 {approx = true} : vector<8x1xf32> -> vector<8x1xf32>
    %229 = arith.mulf %227, %228 : vector<8x1xf32>
    %cst_70 = arith.constant 2.000000e+00 : f32
    %230 = vector.broadcast %cst_70 : f32 to vector<8x1xf32>
    %231 = arith.subf %230, %229 : vector<8x1xf32>
    %232 = arith.mulf %228, %231 : vector<8x1xf32>
    %233 = vector.broadcast %232 : vector<8x1xf32> to vector<8x8xf32>
    %234 = arith.mulf %225, %233 : vector<8x8xf32>
    %cst_71 = arith.constant 0.000000e+00 : f32
    %235 = vector.broadcast %cst_71 : f32 to vector<8x8xf32>
    %236 = arith.select %159, %234, %235 : vector<8x8xi1>, vector<8x8xf32>
    %cst_72 = arith.constant dense<0.000000e+00> : vector<8x8xf32>
    %237 = tpu.matmul %236, %214, %cst_72 {dimension_numbers = #tpu.dot_dimension_numbers<[1], [0], [0], [1], [0, 0, 1, 1], [], []>} : vector<8x8xf32>, vector<8x8xf32>, vector<8x8xf32> -> vector<8x8xf32>
    %238 = vector.extract_strided_slice %153 {offsets = [0, 24], sizes = [8, 8], strides = [1, 1]} : vector<8x32xf32> to vector<8x8xf32>
    %239 = vector.extract_strided_slice %154 {offsets = [0, 24], sizes = [8, 8], strides = [1, 1]} : vector<8x32xf32> to vector<8x8xf32>
    %240 = vector.extract_strided_slice %155 {offsets = [0, 24], sizes = [8, 8], strides = [1, 1]} : vector<8x32xf32> to vector<8x8xf32>
    %241 = tpu.transpose %239, [1, 0] : vector<8x8xf32> -> vector<8x8xf32>
    %cst_73 = arith.constant dense<0.000000e+00> : vector<8x8xf32>
    %242 = tpu.matmul %238, %241, %cst_73 {dimension_numbers = #tpu.dot_dimension_numbers<[1], [0], [0], [1], [0, 0, 1, 1], [], []>} : vector<8x8xf32>, vector<8x8xf32>, vector<8x8xf32> -> vector<8x8xf32>
    %cst_74 = arith.constant 0.353553385 : f32
    %243 = vector.broadcast %cst_74 : f32 to vector<8x8xf32>
    %244 = arith.mulf %242, %243 : vector<8x8xf32>
    %cst_75 = arith.constant -1.000000e+30 : f32
    %245 = vector.broadcast %cst_75 : f32 to vector<8x8xf32>
    %246 = arith.select %159, %244, %245 : vector<8x8xi1>, vector<8x8xf32>
    %cst_76 = arith.constant dense<0xFF800000> : vector<8xf32>
    %247 = vector.multi_reduction <maximumf>, %246, %cst_76 [1] : vector<8x8xf32> to vector<8xf32>
    %248 = vector.shape_cast %247 : vector<8xf32> to vector<8x1xf32>
    %249 = vector.broadcast %248 : vector<8x1xf32> to vector<8x8xf32>
    %250 = arith.subf %246, %249 : vector<8x8xf32>
    %251 = math.exp %250 : vector<8x8xf32>
    %cst_77 = arith.constant dense<0.000000e+00> : vector<8xf32>
    %252 = vector.multi_reduction <add>, %251, %cst_77 [1] : vector<8x8xf32> to vector<8xf32>
    %253 = vector.shape_cast %252 : vector<8xf32> to vector<8x1xf32>
    %254 = tpu.reciprocal %253 {approx = true} : vector<8x1xf32> -> vector<8x1xf32>
    %255 = arith.mulf %253, %254 : vector<8x1xf32>
    %cst_78 = arith.constant 2.000000e+00 : f32
    %256 = vector.broadcast %cst_78 : f32 to vector<8x1xf32>
    %257 = arith.subf %256, %255 : vector<8x1xf32>
    %258 = arith.mulf %254, %257 : vector<8x1xf32>
    %259 = vector.broadcast %258 : vector<8x1xf32> to vector<8x8xf32>
    %260 = arith.mulf %251, %259 : vector<8x8xf32>
    %cst_79 = arith.constant 0.000000e+00 : f32
    %261 = vector.broadcast %cst_79 : f32 to vector<8x8xf32>
    %262 = arith.select %159, %260, %261 : vector<8x8xi1>, vector<8x8xf32>
    %cst_80 = arith.constant dense<0.000000e+00> : vector<8x8xf32>
    %263 = tpu.matmul %262, %240, %cst_80 {dimension_numbers = #tpu.dot_dimension_numbers<[1], [0], [0], [1], [0, 0, 1, 1], [], []>} : vector<8x8xf32>, vector<8x8xf32>, vector<8x8xf32> -> vector<8x8xf32>
    %264 = tpu.concatenate %185, %211, %237, %263 in 1 : vector<8x8xf32>, vector<8x8xf32>, vector<8x8xf32>, vector<8x8xf32> -> vector<8x32xf32>
    %265 = tpu.concatenate %152, %264 in 0 : vector<8x32xf32>, vector<8x32xf32> -> vector<16x32xf32>
    %cst_81 = arith.constant dense<0.000000e+00> : vector<16x32xf32>
    %266 = tpu.matmul %265, %12, %cst_81 {dimension_numbers = #tpu.dot_dimension_numbers<[1], [0], [0], [1], [0, 0, 1, 1], [], []>} : vector<16x32xf32>, vector<32x32xf32>, vector<16x32xf32> -> vector<16x32xf32>
    %267 = arith.addf %0, %266 : vector<16x32xf32>
    %268 = vector.broadcast %7 : vector<1x32xf32> to vector<16x32xf32>
    %269 = arith.addf %267, %268 : vector<16x32xf32>
    %cst_82 = arith.constant dense<0.000000e+00> : vector<16xf32>
    %270 = vector.multi_reduction <add>, %269, %cst_82 [1] : vector<16x32xf32> to vector<16xf32>
    %271 = vector.shape_cast %270 : vector<16xf32> to vector<16x1xf32>
    %cst_83 = arith.constant 3.200000e+01 : f32
    %272 = vector.broadcast %cst_83 : f32 to vector<16x1xf32>
    %273 = arith.divf %271, %272 : vector<16x1xf32>
    %274 = vector.broadcast %273 : vector<16x1xf32> to vector<16x32xf32>
    %275 = arith.subf %269, %274 : vector<16x32xf32>
    %276 = arith.mulf %275, %275 : vector<16x32xf32>
    %cst_84 = arith.constant dense<0.000000e+00> : vector<16xf32>
    %277 = vector.multi_reduction <add>, %276, %cst_84 [1] : vector<16x32xf32> to vector<16xf32>
    %278 = vector.shape_cast %277 : vector<16xf32> to vector<16x1xf32>
    %cst_85 = arith.constant 3.200000e+01 : f32
    %279 = vector.broadcast %cst_85 : f32 to vector<16x1xf32>
    %280 = arith.divf %278, %279 : vector<16x1xf32>
    %281 = vector.broadcast %273 : vector<16x1xf32> to vector<16x32xf32>
    %282 = arith.subf %269, %281 : vector<16x32xf32>
    %cst_86 = arith.constant 9.99999996E-13 : f32
    %283 = vector.broadcast %cst_86 : f32 to vector<16x1xf32>
    %284 = arith.addf %280, %283 : vector<16x1xf32>
    %285 = math.rsqrt %284 : vector<16x1xf32>
    %286 = vector.broadcast %285 : vector<16x1xf32> to vector<16x32xf32>
    %287 = arith.mulf %282, %286 : vector<16x32xf32>
    %288 = vector.broadcast %4 : vector<1x32xf32> to vector<16x32xf32>
    %289 = arith.mulf %287, %288 : vector<16x32xf32>
    %290 = vector.broadcast %5 : vector<1x32xf32> to vector<16x32xf32>
    %291 = arith.addf %289, %290 : vector<16x32xf32>
    %cst_87 = arith.constant dense<0.000000e+00> : vector<16x64xf32>
    %292 = tpu.matmul %291, %13, %cst_87 {dimension_numbers = #tpu.dot_dimension_numbers<[1], [0], [0], [1], [0, 0, 1, 1], [], []>} : vector<16x32xf32>, vector<32x64xf32>, vector<16x64xf32> -> vector<16x64xf32>
    %293 = vector.broadcast %8 : vector<1x64xf32> to vector<16x64xf32>
    %294 = arith.addf %292, %293 : vector<16x64xf32>
    %cst_88 = arith.constant 0.000000e+00 : f32
    %295 = vector.broadcast %cst_88 : f32 to vector<16x64xf32>
    %296 = arith.maximumf %294, %295 : vector<16x64xf32>
    %cst_89 = arith.constant dense<0.000000e+00> : vector<16x32xf32>
    %297 = tpu.matmul %296, %14, %cst_89 {dimension_numbers = #tpu.dot_dimension_numbers<[1], [0], [0], [1], [0, 0, 1, 1], [], []>} : vector<16x64xf32>, vector<64x32xf32>, vector<16x32xf32> -> vector<16x32xf32>
    %298 = vector.broadcast %9 : vector<1x32xf32> to vector<16x32xf32>
    %299 = arith.addf %297, %298 : vector<16x32xf32>
    %300 = arith.addf %269, %299 : vector<16x32xf32>
    %c0_90 = arith.constant 0 : index
    %c0_91 = arith.constant 0 : index
    %301 = vector.load %arg6[%c0_90, %c0_91] : memref<16x32xf32, #tpu.memory_space<vmem>>, vector<16x32xf32>
    tpu.vector_store %arg6[%c0_90, %c0_91], %300 {strides = array<i32>} : memref<16x32xf32, #tpu.memory_space<vmem>>, vector<16x32xf32>,
    return
  }
  func.func @transform_0(%arg0: i32) -> (i32, i32) {
    %c0_i32 = arith.constant 0 : i32
    %c0_i32_0 = arith.constant 0 : i32
    return %arg0, %c0_i32 : i32, i32
  }
  func.func @transform_1(%arg0: i32) -> (i32, i32, i32) {
    %c0_i32 = arith.constant 0 : i32
    %c0_i32_0 = arith.constant 0 : i32
    %c0_i32_1 = arith.constant 0 : i32
    return %arg0, %c0_i32, %c0_i32_0 : i32, i32, i32
  }
  func.func @transform_2(%arg0: i32) -> (i32, i32) {
    %c0_i32 = arith.constant 0 : i32
    %c0_i32_0 = arith.constant 0 : i32
    %c0_i32_1 = arith.constant 0 : i32
    return %c0_i32, %c0_i32_0 : i32, i32
  }
  func.func @transform_3(%arg0: i32) -> (i32, i32) {
    %c0_i32 = arith.constant 0 : i32
    %c0_i32_0 = arith.constant 0 : i32
    %c0_i32_1 = arith.constant 0 : i32
    return %c0_i32, %c0_i32_0 : i32, i32
  }
  func.func @transform_4(%arg0: i32) -> (i32, i32) {
    %c0_i32 = arith.constant 0 : i32
    %c0_i32_0 = arith.constant 0 : i32
    %c0_i32_1 = arith.constant 0 : i32
    return %c0_i32, %c0_i32_0 : i32, i32
  }
  func.func @transform_5(%arg0: i32) -> (i32, i32) {
    %c0_i32 = arith.constant 0 : i32
    %c0_i32_0 = arith.constant 0 : i32
    return %arg0, %c0_i32 : i32, i32
  }
}

</mosaic_0001>

<bundles_post_ra>
// kernel: tpu_custom_call.1
= control target key start
LH: loop header
LB: loop body
LE: loop exit
PB: predicated region body
PF: predicated region fallthrough
CT: control target
= control target key end

     0   :  { %10 = vsyncpa [#allocation3], 0  ;;  %s1452_s0 = inlined_call_operand.vmem [shape: f32[16,32], index: 0, kind: input, shape index: {}]   ;;  %s1453_s1 = inlined_call_operand.vmem [shape: f32[2,8,8], index: 1, kind: input, shape index: {}]   ;;  %s1454_s2 = inlined_call_operand.vmem [shape: f32[32,192], index: 2, kind: input, shape index: {}]   ;;  %s1455_s3 = inlined_call_operand.vmem [shape: f32[64,32], index: 3, kind: input, shape index: {}]   ;;  %s1456_s4 = inlined_call_operand.hbm [shape: f32[8,96], index: 4, kind: input, shape index: {}]   ;;  %s1457_s5 = inlined_call_operand.hbm [shape: f32[16,32], index: 5, kind: output, shape index: {}]  }
   0x1   :  { %11 = vsyncpa [#allocation4], 0  ;;  %s25_s20 = sshll.u32 %s1456_s4, 4  ;;  %s1086_s21 = smov [#allocation2]   ;;  %s26_s20 = int_to_ptr.hbm [resolvable:$true] %s25_s20 }
   0x2   :  { %s27_s22 = sshll.u32 %s1086_s21, 4  ;;  %s28_s22 = int_to_ptr.vmem [resolvable:$true] %s27_s22 }
   0x3   :  { %30 = dma.hbm_to_vmem [thread:$0]  %s26_s20, 128, %s28_s22, [#allocation3]  }
   0x4   :  { %1082 = dma.done.wait [#allocation3], 128  }
   0x5   :  { %1083 = vsyncadd [#allocation3], 4294967168  ;;  %vm54_vm0 = vcmask 261120   ;;  %v1141_v0 = vld [vmem:[%s1452_s0] sm:$0xff]  ;;  %v1087_v2 = vmov 32.0   ;;  %v1153_v14 = vld [vmem:[%s1454_s2 + $0x30] sm:$0xff] }
   0x6   :  { %v55_v1 = vsel %vm54_vm0, %v1141_v0, 0.0  ;;  %992 = vrcp.f32 %v1087_v2  ;;  %131 = vmatpush.msra.mxu0 %v1153_v14  ;;  %v1159_v15 = vld [vmem:[%s1454_s2 + $0x20] sm:$0xff]  ;;  %v1164_v16 = vld [vmem:[%s1454_s2 + $0x10] sm:$0xff]  ;;  %s1088_s7 = smov 120   ;;  %s1089_s8 = smov 88   ;;  %vm148_vm5 = vcmask 64512  }
   0x7   :  { %56 = vadd.xlane.f32.xlu0 %v55_v1  ;;  %v1169_v17 = vld [vmem:[%s1454_s2] sm:$0xff]  ;;  %v982_v18 = vpack.i.bf16 %v1159_v15, %v1153_v14  ;;  %s1090_s9 = smov 96   ;;  %s1091_s10 = smov 80   ;;  %v1233_v60 = vld [vmem:[%s1452_s0 + $0x8] sm:$0xff]  ;;  %vm442_vm11 = vcmask 130048   ;;  %vm444_vm12 = vcmask 195584  }
   0x8   :  { %v987_v19 = vpack.i.bf16 %v1169_v17, %v1164_v16  ;;  %132 = vmatpush.msra.mxu0 %v1159_v15  ;;  %v1179_v28 = vld [vmem:[#allocation2] sm:$0xff]  ;;  %s1092_s11 = smov 112   ;;  %s1093_s14 = smov 48   ;;  %v58_v61 = vsel %vm54_vm0, %v1233_v60, 0.0 }
   0x9   :  { %v106_v30 = vperm.slane %v1179_v28, 0  ;;  %v109_v33 = vperm.slane %v1179_v28, 1  ;;  %v112_v36 = vperm.slane %v1179_v28, 4  ;;  %v1211_v42 = vld [vmem:[%s1453_s1] sm:$0xff]  ;;  %s1094_s15 = smov 64   ;;  %s1095_s18 = smov 56  }
   0xa   :  { %133 = vmatpush.msra.mxu0 %v1164_v16  ;;  %vm144_vm6 = vcmp.gt.f32.partialorder %v1211_v42, 0.0  ;;  %s1096_s19 = smov 104   ;;  %s1097_s0 = smov 72  }
   0xb   :  { %s1099_s22 = smov 8   ;;  %s1100_s23 = smov 32  }
   0xc   :  { %v993_v3 = vpop.eup %992  ;;  %134 = vmatpush.msra.mxu0 %v1169_v17  ;;  %s1101_s24 = smov 16   ;;  %s1102_s4 = smov 24  }
   0xd   :  { %v62_v4 = vmul.f32 32.0, %v993_v3  ;;  %vm66_vm1 = vweird.f32 %v993_v3  ;;  %s1104_s25 = smov 128  }
   0xf   :  { %v63_v5 = vsub.f32 1.0, %v62_v4 }
  0x11   :  { %v64_v6 = vmul.f32 %v993_v3, %v63_v5 }
  0x13   :  { %v65_v7 = vadd.f32 %v993_v3, %v64_v6 }
  0x15   :  { %v1145_v8 = vsel %vm66_vm1, %v993_v3, %v65_v7  ;;  %vm878_vm1 = vcmask 523264  }
  0x7a   :  { %v57_v9 = vpop.xlane.xlu0 %56 }
  0x7b   :  { %v68_v10 = vmul.f32 %v1145_v8, %v57_v9 }
  0x7d   :  { %v70_v11 = vsub.f32 %v1141_v0, %v68_v10 }
  0x7f   :  { %v72_v12 = vmul.f32 %v70_v11, %v70_v11 }
  0x81   :  { %v74_v13 = vsel %vm54_vm0, %v72_v12, 0.0 }
  0x82   :  { %75 = vadd.xlane.f32.xlu0 %v74_v13 }
  0xf5   :  { %v76_v20 = vpop.xlane.xlu0 %75 }
  0xf6   :  { %v80_v21 = vmul.f32 %v76_v20, %v1145_v8 }
  0xf8   :  { %v82_v22 = vadd.f32 1e-12, %v80_v21 }
  0xfa   :  { %994 = vrsqrt.f32 %v82_v22  ;;  %vm90_vm3 = vweird.f32 %v82_v22 }
 0x100   :  { %v995_v23 = vpop.eup %994 }
 0x101   :  { %v85_v24 = vmul.f32 %v995_v23, %v82_v22  ;;  %vm91_vm2 = vweird.f32 %v995_v23 }
 0x102   :  { %vm92_vm4 = vmor %vm90_vm3, %vm91_vm2 }
 0x103   :  { %v86_v25 = vmul.f32 %v995_v23, %v85_v24 }
 0x105   :  { %v87_v26 = vmul.f32 0.5, %v86_v25 }
 0x107   :  { %v88_v27 = vsub.f32 1.5, %v87_v26 }
 0x109   :  { %v89_v29 = vmul.f32 %v995_v23, %v88_v27 }
 0x10b   :  { %v93_v31 = vsel %vm92_vm4, %v995_v23, %v89_v29 }
 0x10c   :  { %v104_v32 = vmul.f32 %v93_v31, %v70_v11 }
 0x10e   :  { %v107_v34 = vmul.f32 %v106_v30, %v104_v32 }
 0x110   :  { %v110_v35 = vadd.f32 %v109_v33, %v107_v34 }
 0x112   :  { %931 = vmatmul.msk.f32.vlgmr.msra.gmra.mxu0 %vm54_vm0, %v110_v35 }
 0x18f   :  { %v136_v37 = vpop.f32.mrf.mxu0 }
 0x190   :  { %v1191_v38 = vadd.f32 %v136_v37, %v112_v36 }
 0x192   :  { %216 = vrot.lane.b32.xlu0 %v1191_v38, %s1088_s7  ;;  %218 = vrot.lane.b32.xlu2 %v1191_v38, %s1089_s8 }
 0x193   :  { %146 = vrot.lane.b32.xlu1 %v1191_v38, %s1090_s9 }
 0x19a   :  { %289 = vrot.lane.b32.xlu0 %v1191_v38, %s1091_s10 }
 0x1a2   :  { %287 = vrot.lane.b32.xlu0 %v1191_v38, %s1092_s11 }
 0x1ec   :  { %v219_v39 = vpop.permute.xlu2 %218 }
 0x1ed   :  { %936 = vmatpush.xpose.msk.msra.mxu3 %vm148_vm5, %v219_v39 }
 0x204   :  { %v217_v40 = vpop.permute.xlu0 %216 }
 0x205   :  { %v147_v41 = vpop.permute.xlu1 %146  ;;  %937 = vmatmul.msk.f32.vlgmr.msra.gmra.mxu3 %vm148_vm5, %v217_v40 }
 0x206   :  { %933 = vmatpush.xpose.msk.msra.mxu1 %vm148_vm5, %v147_v41 }
 0x209   :  { %934 = vmatmul.msk.f32.vlgmr.msra.gmra.mxu1 %vm148_vm5, %v1191_v38 }
 0x20c   :  { %v290_v51 = vpop.permute.xlu0 %289 }
 0x214   :  { %v288_v55 = vpop.permute.xlu0 %287 }
 0x286   :  { %v170_v43 = vpop.f32.mrf.mxu1 }
 0x287   :  { %v173_v44 = vmul.f32 0.35355338, %v170_v43 }
 0x288   :  { %v241_v45 = vpop.f32.mrf.mxu3 }
 0x289   :  { %v244_v46 = vmul.f32 0.35355338, %v241_v45  ;;  %v174_v47 = vsel %vm144_vm6, %v173_v44, -1e+30 }
 0x28a   :  { %v175_v48 = vsel %vm148_vm5, %v174_v47, -inf }
 0x28b   :  { %176 = vmax.xlane.f32.xlu1 %v175_v48  ;;  %v1219_v49 = vsel %vm144_vm6, %v244_v46, -1e+30 }
 0x28c   :  { %v246_v50 = vsel %vm148_vm5, %v1219_v49, -inf }
 0x28d   :  { %247 = vmax.xlane.f32.xlu0 %v246_v50 }
 0x2a1   :  { %332 = vrot.lane.b32.xlu0 %v1191_v38, %s1093_s14 }
 0x2fe   :  { %v177_v52 = vpop.xlane.xlu1 %176 }
 0x2ff   :  { %v178_v53 = vsub.f32 %v174_v47, %v177_v52 }
 0x300   :  { %v1226_v58 = vpop.xlane.xlu0 %247 }
 0x301   :  { %v179_v54 = vmul.f32 1.442695, %v178_v53 }
 0x303   :  { %996 = vpow2.f32 %v179_v54 }
 0x309   :  { %v997_v56 = vpop.eup %996 }
 0x30a   :  { %v181_v57 = vsel %vm148_vm5, %v997_v56, 0.0 }
 0x30b   :  { %182 = vadd.xlane.f32.xlu2 %v181_v57 }
 0x313   :  { %v333_v59 = vpop.permute.xlu0 %332 }
 0x314   :  { %353 = vmatpush.msrb.mxu3 %v333_v59 }
 0x323   :  { %190 = vrot.lane.b32.xlu2 %v1191_v38, %s1094_s15 }
 0x34c   :  { %59 = vadd.xlane.f32.xlu2 %v58_v61 }
 0x364   :  { %261 = vrot.lane.b32.xlu2 %v1191_v38, %s1095_s18 }
 0x36c   :  { %358 = vrot.lane.b32.xlu2 %v1191_v38, %s1096_s19 }
 0x37e   :  { %v183_v62 = vpop.xlane.xlu2 %182 }
 0x37f   :  { %998 = vrcp.f32 %v183_v62 }
 0x385   :  { %v999_v63 = vpop.eup %998 }
 0x386   :  { %v185_v1 = vmul.f32 %v999_v63, %v183_v62  ;;  %v191_v2 = vpop.permute.xlu2 %190 }
 0x387   :  { %211 = vmatpush.msrb.mxu1 %v191_v2 }
 0x388   :  { %v186_v3 = vsub.f32 2.0, %v185_v1 }
 0x389   :  { %939 = vmatpush.xpose.msk.msra.mxu1 %vm148_vm5, %v290_v51 }
 0x38a   :  { %v187_v4 = vmul.f32 %v999_v63, %v186_v3 }
 0x38c   :  { %v188_v5 = vmul.f32 %v997_v56, %v187_v4 }
 0x38e   :  { %v189_v6 = vsel %vm144_vm6, %v188_v5, 0.0 }
 0x38f   :  { %935 = vmatmul.msk.f32.vlgmr.msrb.gmra.mxu1 %vm148_vm5, %v189_v6 }
 0x397   :  { %940 = vmatmul.msk.f32.vlgmr.msra.gmra.mxu1 %vm148_vm5, %v288_v55 }
 0x3bf   :  { %v60_v7 = vpop.xlane.xlu2 %59 }
 0x3c0   :  { %v69_v9 = vmul.f32 %v1145_v8, %v60_v7 }
 0x3c2   :  { %v71_v10 = vsub.f32 %v1233_v60, %v69_v9 }
 0x3c4   :  { %v73_v11 = vmul.f32 %v71_v10, %v71_v10 }
 0x3c6   :  { %v77_v12 = vsel %vm54_vm0, %v73_v11, 0.0 }
 0x3c7   :  { %78 = vadd.xlane.f32.xlu1 %v77_v12  ;;  %v262_v13 = vpop.permute.xlu2 %261 }
 0x3c8   :  { %282 = vmatpush.msra.mxu2 %v262_v13 }
 0x3cf   :  { %v359_v51 = vpop.permute.xlu2 %358 }
 0x3e0   :  { %360 = vrot.lane.b32.xlu1 %v1191_v38, %s1097_s0 }
 0x43a   :  { %v79_v20 = vpop.xlane.xlu1 %78 }
 0x43b   :  { %v81_v21 = vmul.f32 %v79_v20, %v1145_v8 }
 0x43d   :  { %v83_v22 = vadd.f32 1e-12, %v81_v21 }
 0x43f   :  { %1000 = vrsqrt.f32 %v83_v22  ;;  %vm100_vm8 = vweird.f32 %v83_v22 }
 0x445   :  { %v1001_v23 = vpop.eup %1000 }
 0x446   :  { %v95_v24 = vmul.f32 %v1001_v23, %v83_v22  ;;  %vm101_vm7 = vweird.f32 %v1001_v23 }
 0x447   :  { %vm102_vm9 = vmor %vm100_vm8, %vm101_vm7 }
 0x448   :  { %v96_v25 = vmul.f32 %v1001_v23, %v95_v24  ;;  %v1305_v24 = vld [vmem:[%s1453_s1 + $0x8] sm:$0xff]  ;;  %s1098_s1 = smov 40  }
 0x449   :  { %vm446_vm10 = vcmp.gt.f32.partialorder %v1305_v24, 0.0 }
 0x44a   :  { %v97_v26 = vmul.f32 0.5, %v96_v25 }
 0x44c   :  { %v98_v27 = vsub.f32 1.5, %v97_v26 }
 0x44e   :  { %v99_v29 = vmul.f32 %v1001_v23, %v98_v27 }
 0x450   :  { %v103_v31 = vsel %vm102_vm9, %v1001_v23, %v99_v29 }
 0x451   :  { %v105_v32 = vmul.f32 %v103_v31, %v71_v10 }
 0x452   :  { %v361_v34 = vpop.permute.xlu1 %360 }
 0x453   :  { %942 = vmatpush.xpose.msk.msrb.mxu2 %vm148_vm5, %v361_v34  ;;  %v108_v35 = vmul.f32 %v106_v30, %v105_v32  ;;  %v249_v30 = vsub.f32 %v1219_v49, %v1226_v58 }
 0x455   :  { %v111_v37 = vadd.f32 %v109_v33, %v108_v35  ;;  %v250_v33 = vmul.f32 1.442695, %v249_v30 }
 0x457   :  { %932 = vmatmul.msk.f32.gmra.mxu0 %vm54_vm0, %v111_v37  ;;  %1002 = vpow2.f32 %v250_v33 }
 0x45d   :  { %v1003_v41 = vpop.eup %1002 }
 0x45e   :  { %v252_v44 = vsel %vm148_vm5, %v1003_v41, 0.0 }
 0x4d4   :  { %v139_v39 = vpop.f32.mrf.mxu0 }
 0x4d5   :  { %v1259_v40 = vadd.f32 %v139_v39, %v112_v36  ;;  %v1272_v36 = vpop.f32.mrf.mxu1 }
 0x4d7   :  { %517 = vrot.lane.b32.xlu0 %v1259_v40, %s1088_s7  ;;  %519 = vrot.lane.b32.xlu2 %v1259_v40, %s1089_s8 }
 0x4d8   :  { %448 = vrot.lane.b32.xlu1 %v1259_v40, %s1090_s9 }
 0x4dd   :  { %v312_v43 = vpop.f32.mrf.mxu1 }
 0x4de   :  { %v315_v45 = vmul.f32 0.35355338, %v312_v43 }
 0x4df   :  { %588 = vrot.lane.b32.xlu0 %v1259_v40, %s1092_s11  ;;  %661 = vrot.lane.b32.xlu2 %v1259_v40, %s1097_s0 }
 0x4e0   :  { %v316_v46 = vsel %vm144_vm6, %v315_v45, -1e+30 }
 0x4e1   :  { %v317_v47 = vsel %vm148_vm5, %v316_v46, -inf }
 0x502   :  { %253 = vadd.xlane.f32.xlu1 %v252_v44 }
 0x50a   :  { %318 = vmax.xlane.f32.xlu1 %v317_v47 }
 0x523   :  { %590 = vrot.lane.b32.xlu1 %v1259_v40, %s1091_s10 }
 0x531   :  { %v520_v59 = vpop.permute.xlu2 %519 }
 0x539   :  { %v662_v1 = vpop.permute.xlu2 %661 }
 0x549   :  { %v518_v2 = vpop.permute.xlu0 %517 }
 0x54a   :  { %v449_v48 = vpop.permute.xlu1 %448 }
 0x54b   :  { %945 = vmatpush.xpose.msk.msra.mxu3 %vm148_vm5, %v449_v48 }
 0x551   :  { %v589_v29 = vpop.permute.xlu0 %588 }
 0x575   :  { %v254_v49 = vpop.xlane.xlu1 %253 }
 0x576   :  { %1004 = vrcp.f32 %v254_v49 }
 0x57c   :  { %v1005_v50 = vpop.eup %1004 }
 0x57d   :  { %v256_v52 = vmul.f32 %v1005_v50, %v254_v49  ;;  %v319_v53 = vpop.xlane.xlu1 %318 }
 0x57e   :  { %v320_v54 = vsub.f32 %v316_v46, %v319_v53 }
 0x57f   :  { %v257_v55 = vsub.f32 2.0, %v256_v52 }
 0x580   :  { %v321_v56 = vmul.f32 1.442695, %v320_v54 }
 0x581   :  { %v258_v57 = vmul.f32 %v1005_v50, %v257_v55 }
 0x582   :  { %1006 = vpow2.f32 %v321_v56 }
 0x583   :  { %v259_v58 = vmul.f32 %v1003_v41, %v258_v57 }
 0x585   :  { %v260_v61 = vsel %vm144_vm6, %v259_v58, 0.0 }
 0x586   :  { %938 = vmatmul.msk.f32.vlgmr.msra.gmra.mxu2 %vm148_vm5, %v260_v61 }
 0x587   :  { %948 = vmatpush.xpose.msk.msra.mxu2 %vm148_vm5, %v520_v59 }
 0x588   :  { %v1007_v62 = vpop.eup %1006 }
 0x589   :  { %v323_v63 = vsel %vm148_vm5, %v1007_v62, 0.0 }
 0x58a   :  { %324 = vadd.xlane.f32.xlu1 %v323_v63 }
 0x58e   :  { %943 = vmatmul.msk.f32.vlgmr.msrb.gmra.mxu2 %vm148_vm5, %v359_v51 }
 0x58f   :  { %954 = vmatpush.xpose.msk.msrb.mxu2 %vm148_vm5, %v662_v1 }
 0x595   :  { %v591_v3 = vpop.permute.xlu1 %590 }
 0x596   :  { %949 = vmatmul.msk.f32.vlgmr.msra.gmra.mxu2 %vm148_vm5, %v518_v2 }
 0x5a3   :  { %659 = vrot.lane.b32.xlu1 %v1259_v40, %s1096_s19 }
 0x5fd   :  { %v325_v4 = vpop.xlane.xlu1 %324 }
 0x5fe   :  { %1008 = vrcp.f32 %v325_v4 }
 0x604   :  { %v1009_v5 = vpop.eup %1008 }
 0x605   :  { %v327_v6 = vmul.f32 %v1009_v5, %v325_v4 }
 0x607   :  { %v328_v7 = vsub.f32 2.0, %v327_v6 }
 0x609   :  { %v329_v9 = vmul.f32 %v1009_v5, %v328_v7  ;;  %v1291_v10 = vpop.f32.mrf.mxu2 }
 0x60b   :  { %v330_v11 = vmul.f32 %v1007_v62, %v329_v9 }
 0x60d   :  { %v331_v12 = vsel %vm144_vm6, %v330_v11, 0.0 }
 0x60e   :  { %941 = vmatmul.msk.f32.vlgmr.msrb.gmra.mxu3 %vm148_vm5, %v331_v12 }
 0x60f   :  { %951 = vmatpush.xpose.msk.msrb.mxu3 %vm148_vm5, %v591_v3 }
 0x611   :  { %v383_v13 = vpop.f32.mrf.mxu2 }
 0x612   :  { %v386_v20 = vmul.f32 0.35355338, %v383_v13 }
 0x614   :  { %v387_v21 = vsel %vm144_vm6, %v386_v20, -1e+30 }
 0x615   :  { %v660_v22 = vpop.permute.xlu1 %659  ;;  %v388_v23 = vsel %vm148_vm5, %v387_v21, -inf }
 0x616   :  { %946 = vmatmul.msk.f32.vlgmr.msra.gmra.mxu3 %vm148_vm5, %v1259_v40  ;;  %389 = vmax.xlane.f32.xlu2 %v388_v23 }
 0x617   :  { %955 = vmatmul.msk.f32.vlgmr.msrb.gmra.mxu2 %vm148_vm5, %v660_v22 }
 0x619   :  { %v542_v25 = vpop.f32.mrf.mxu2 }
 0x61a   :  { %v545_v26 = vmul.f32 0.35355338, %v542_v25 }
 0x61c   :  { %v546_v27 = vsel %vm446_vm10, %v545_v26, -1e+30 }
 0x61d   :  { %v547_v31 = vsel %vm148_vm5, %v546_v27, -inf }
 0x61e   :  { %952 = vmatmul.msk.f32.vlgmr.msrb.gmra.mxu3 %vm148_vm5, %v589_v29  ;;  %548 = vmax.xlane.f32.xlu1 %v547_v31 }
 0x689   :  { %v390_v32 = vpop.xlane.xlu2 %389 }
 0x68a   :  { %v391_v34 = vsub.f32 %v387_v21, %v390_v32 }
 0x68c   :  { %v392_v35 = vmul.f32 1.442695, %v391_v34 }
 0x68e   :  { %1010 = vpow2.f32 %v392_v35 }
 0x691   :  { %v1313_v37 = vpop.f32.mrf.mxu3  ;;  %v549_v33 = vpop.xlane.xlu1 %548 }
 0x692   :  { %v550_v45 = vsub.f32 %v546_v27, %v549_v33 }
 0x694   :  { %v1011_v39 = vpop.eup %1010  ;;  %v551_v49 = vmul.f32 1.442695, %v550_v45 }
 0x695   :  { %v394_v30 = vsel %vm148_vm5, %v1011_v39, 0.0 }
 0x696   :  { %395 = vadd.xlane.f32.xlu1 %v394_v30  ;;  %1012 = vpow2.f32 %v551_v49 }
 0x699   :  { %v471_v41 = vpop.f32.mrf.mxu3 }
 0x69a   :  { %v474_v43 = vmul.f32 0.35355338, %v471_v41  ;;  %v684_v44 = vpop.f32.mrf.mxu2 }
 0x69b   :  { %v687_v48 = vmul.f32 0.35355338, %v684_v44 }
 0x69c   :  { %v475_v46 = vsel %vm446_vm10, %v474_v43, -1e+30  ;;  %v1325_v56 = vpop.eup %1012 }
 0x69d   :  { %v476_v47 = vsel %vm148_vm5, %v475_v46, -inf  ;;  %v688_v52 = vsel %vm446_vm10, %v687_v48, -1e+30  ;;  %v553_v57 = vsel %vm148_vm5, %v1325_v56, 0.0 }
 0x69e   :  { %477 = vmax.xlane.f32.xlu0 %v476_v47  ;;  %v689_v55 = vsel %vm148_vm5, %v688_v52, -inf }
 0x6a1   :  { %v613_v50 = vpop.f32.mrf.mxu3 }
 0x6a2   :  { %v616_v51 = vmul.f32 0.35355338, %v613_v50 }
 0x6a4   :  { %v617_v53 = vsel %vm446_vm10, %v616_v51, -1e+30 }
 0x6a5   :  { %v618_v54 = vsel %vm148_vm5, %v617_v53, -inf }
 0x6a6   :  { %619 = vmax.xlane.f32.xlu2 %v618_v54  ;;  %690 = vmax.xlane.f32.xlu0 %v689_v55 }
 0x6ae   :  { %554 = vadd.xlane.f32.xlu0 %v553_v57 }
 0x6af   :  { %491 = vrot.lane.b32.xlu1 %v1259_v40, %s1094_s15 }
 0x6be   :  { %403 = vrot.lane.b32.xlu2 %v1191_v38, %s1098_s1 }
 0x709   :  { %v396_v58 = vpop.xlane.xlu1 %395 }
 0x70a   :  { %1014 = vrcp.f32 %v396_v58 }
 0x710   :  { %v1015_v59 = vpop.eup %1014 }
 0x711   :  { %v478_v61 = vpop.xlane.xlu0 %477  ;;  %v398_v63 = vmul.f32 %v1015_v59, %v396_v58 }
 0x712   :  { %v479_v62 = vsub.f32 %v475_v46, %v478_v61 }
 0x713   :  { %v399_v2 = vsub.f32 2.0, %v398_v63 }
 0x714   :  { %v480_v1 = vmul.f32 1.442695, %v479_v62 }
 0x715   :  { %v400_v7 = vmul.f32 %v1015_v59, %v399_v2 }
 0x716   :  { %1016 = vpow2.f32 %v480_v1 }
 0x717   :  { %v401_v38 = vmul.f32 %v1011_v39, %v400_v7 }
 0x719   :  { %v691_v3 = vpop.xlane.xlu0 %690  ;;  %v620_v4 = vpop.xlane.xlu2 %619  ;;  %v402_v22 = vsel %vm144_vm6, %v401_v38, 0.0 }
 0x71a   :  { %v692_v5 = vsub.f32 %v688_v52, %v691_v3  ;;  %v621_v6 = vsub.f32 %v617_v53, %v620_v4 }
 0x71c   :  { %v1017_v9 = vpop.eup %1016  ;;  %v693_v11 = vmul.f32 1.442695, %v692_v5  ;;  %v622_v12 = vmul.f32 1.442695, %v621_v6 }
 0x71d   :  { %v482_v13 = vsel %vm148_vm5, %v1017_v9, 0.0 }
 0x71e   :  { %1018 = vpow2.f32 %v693_v11  ;;  %483 = vadd.xlane.f32.xlu2 %v482_v13  ;;  %v792_v11 = vperm.slane %v1179_v28, 5 }
 0x71f   :  { %1020 = vpow2.f32 %v622_v12 }
 0x721   :  { %v492_v20 = vpop.permute.xlu1 %491  ;;  %v404_v21 = vpop.permute.xlu2 %403 }
 0x722   :  { %512 = vmatpush.msrb.mxu0 %v492_v20  ;;  %424 = vmatpush.msrb.mxu1 %v404_v21  ;;  %v555_v42 = vpop.xlane.xlu0 %554 }
 0x723   :  { %944 = vmatmul.msk.f32.vlgmr.msrb.gmra.mxu1 %vm148_vm5, %v402_v22 }
 0x724   :  { %v1019_v23 = vpop.eup %1018 }
 0x725   :  { %v1021_v25 = vpop.eup %1020  ;;  %v695_v26 = vsel %vm148_vm5, %v1019_v23, 0.0 }
 0x726   :  { %696 = vadd.xlane.f32.xlu0 %v695_v26  ;;  %v624_v27 = vsel %vm148_vm5, %v1021_v25, 0.0 }
 0x727   :  { %625 = vadd.xlane.f32.xlu1 %v624_v27 }
 0x736   :  { %633 = vrot.lane.b32.xlu2 %v1259_v40, %s1093_s14 }
 0x73a   :  { %562 = vrot.lane.b32.xlu0 %v1259_v40, %s1095_s18 }
 0x73e   :  { %430 = vrot.lane.b32.xlu2 %v1291_v10, %s1099_s22 }
 0x740   :  { %704 = vrot.lane.b32.xlu1 %v1259_v40, %s1098_s1 }
 0x742   :  { %983 = vrot.lane.b32.xlu0 %v982_v18, %s1100_s23 }
 0x748   :  { %988 = vrot.lane.b32.xlu1 %v987_v19, %s1100_s23 }
 0x74a   :  { %434 = vrot.lane.b32.xlu0 %v1313_v37, %s1101_s24 }
 0x791   :  { %v484_v29 = vpop.xlane.xlu2 %483 }
 0x792   :  { %1022 = vrcp.f32 %v484_v29 }
 0x793   :  { %1024 = vrcp.f32 %v555_v42 }
 0x798   :  { %v1023_v10 = vpop.eup %1022 }
 0x799   :  { %v486_v31 = vmul.f32 %v1023_v10, %v484_v29  ;;  %v697_v40 = vpop.xlane.xlu0 %696  ;;  %v634_v32 = vpop.permute.xlu2 %633 }
 0x79a   :  { %v1025_v34 = vpop.eup %1024  ;;  %v626_v35 = vpop.xlane.xlu1 %625  ;;  %654 = vmatpush.msra.mxu0 %v634_v32 }
 0x79b   :  { %v487_v14 = vsub.f32 2.0, %v486_v31  ;;  %1026 = vrcp.f32 %v626_v35  ;;  %v557_v15 = vmul.f32 %v1025_v34, %v555_v42 }
 0x79c   :  { %1028 = vrcp.f32 %v697_v40 }
 0x79d   :  { %v488_v16 = vmul.f32 %v1023_v10, %v487_v14  ;;  %v558_v19 = vsub.f32 2.0, %v557_v15  ;;  %v43_v14 = vld [vmem:[%s1454_s2 + $0x28] sm:$0xff] }
 0x79e   :  { %v39_v15 = vld [vmem:[%s1454_s2 + $0x8] sm:$0xff] }
 0x79f   :  { %v489_v17 = vmul.f32 %v1017_v9, %v488_v16  ;;  %v559_v43 = vmul.f32 %v1025_v34, %v558_v19 }
 0x7a0   :  { %v426_v37 = vpop.f32.mrf.mxu1 }
 0x7a1   :  { %v1027_v18 = vpop.eup %1026  ;;  %v490_v39 = vsel %vm446_vm10, %v489_v17, 0.0  ;;  %438 = vrot.lane.b32.xlu2 %v426_v37, %s1102_s4  ;;  %v560_v47 = vmul.f32 %v1325_v56, %v559_v43  ;;  %v431_v63 = vpop.permute.xlu2 %430 }
 0x7a2   :  { %v1029_v30 = vpop.eup %1028  ;;  %v628_v33 = vmul.f32 %v1027_v18, %v626_v35  ;;  %947 = vmatmul.msk.f32.vlgmr.msrb.gmra.mxu0 %vm148_vm5, %v490_v39  ;;  %v441_v2 = vsel %vm148_vm5, %v1272_v36, %v431_v63  ;;  %v45_v35 = vld [vmem:[%s1454_s2 + $0x38] sm:$0xff]  ;;  %v845_v63 = vperm.slane %v1179_v28, 6 }
 0x7a3   :  { %v699_v44 = vmul.f32 %v1029_v30, %v697_v40  ;;  %v561_v52 = vsel %vm446_vm10, %v560_v47, 0.0  ;;  %864 = vmatpush.msrb.mxu0 %v45_v35  ;;  %v50_v47 = vld [vmem:[%s1455_s3 + $0x20] sm:$0xff] }
 0x7a4   :  { %v629_v41 = vsub.f32 2.0, %v628_v33  ;;  %v53_v33 = vld [vmem:[%s1455_s3 + $0x38] sm:$0xff] }
 0x7a5   :  { %v700_v48 = vsub.f32 2.0, %v699_v44  ;;  %865 = vmatpush.msrb.mxu0 %v43_v14  ;;  %893 = vmatpush.msra.mxu2 %v53_v33  ;;  %v51_v44 = vld [vmem:[%s1455_s3 + $0x28] sm:$0xff] }
 0x7a6   :  { %v630_v45 = vmul.f32 %v1027_v18, %v629_v41  ;;  %v52_v41 = vld [vmem:[%s1455_s3 + $0x30] sm:$0xff] }
 0x7a7   :  { %v701_v51 = vmul.f32 %v1029_v30, %v700_v48  ;;  %894 = vmatpush.msra.mxu2 %v52_v41 }
 0x7a8   :  { %v631_v46 = vmul.f32 %v1021_v25, %v630_v45 }
 0x7a9   :  { %v702_v53 = vmul.f32 %v1019_v23, %v701_v51  ;;  %895 = vmatpush.msra.mxu2 %v51_v44  ;;  %v49_v51 = vld [vmem:[%s1455_s3 + $0x18] sm:$0xff] }
 0x7aa   :  { %v632_v49 = vsel %vm446_vm10, %v631_v46, 0.0  ;;  %v839_v46 = vperm.slane %v1179_v28, 2 }
 0x7ab   :  { %953 = vmatmul.msk.f32.vlgmr.msra.gmra.mxu0 %vm148_vm5, %v632_v49  ;;  %v703_v58 = vsel %vm446_vm10, %v702_v53, 0.0  ;;  %896 = vmatpush.msra.mxu2 %v50_v47 }
 0x7ac   :  { %v563_v50 = vpop.permute.xlu0 %562 }
 0x7ad   :  { %583 = vmatpush.msra.mxu1 %v563_v50  ;;  %v842_v50 = vperm.slane %v1179_v28, 3  ;;  %897 = vmatpush.msra.mxu2 %v49_v51 }
 0x7ae   :  { %950 = vmatmul.msk.f32.vlgmr.msra.gmra.mxu1 %vm148_vm5, %v561_v52 }
 0x7b2   :  { %v705_v54 = vpop.permute.xlu1 %704 }
 0x7b3   :  { %725 = vmatpush.msrb.mxu1 %v705_v54 }
 0x7b4   :  { %v984_v55 = vpop.permute.xlu0 %983 }
 0x7b5   :  { %v986_v57 = vunpack.i.h.bf16 %v984_v55  ;;  %v985_v56 = vunpack.i.l.bf16 %v984_v55 }
 0x7b6   :  { %956 = vmatmul.msk.f32.vlgmr.msrb.gmra.mxu1 %vm148_vm5, %v703_v58 }
 0x7b7   :  { %779 = vmatpush.msra.mxu3 %v985_v56 }
 0x7b9   :  { %780 = vmatpush.msra.mxu3 %v986_v57 }
 0x7ba   :  { %v989_v59 = vpop.permute.xlu1 %988 }
 0x7bb   :  { %v991_v61 = vunpack.i.h.bf16 %v989_v59  ;;  %v990_v62 = vunpack.i.l.bf16 %v989_v59  ;;  %v48_v59 = vld [vmem:[%s1455_s3 + $0x10] sm:$0xff] }
 0x7bc   :  { %v435_v1 = vpop.permute.xlu0 %434  ;;  %898 = vmatpush.msra.mxu2 %v48_v59 }
 0x7bd   :  { %781 = vmatpush.msra.mxu3 %v990_v62  ;;  %v443_v3 = vsel %vm442_vm11, %v441_v2, %v435_v1  ;;  %v46_v62 = vld [vmem:[%s1455_s3] sm:$0xff] }
 0x7bf   :  { %782 = vmatpush.msra.mxu3 %v991_v61  ;;  %v47_v61 = vld [vmem:[%s1455_s3 + $0x8] sm:$0xff]  ;;  %s1103_s3 = smov [#allocation5]  }
 0x7c0   :  { %899 = vmatpush.msra.mxu2 %v47_v61  ;;  %s916_s1 = sshll.u32 %s1103_s3, 4  ;;  %s917_s1 = int_to_ptr.vmem [resolvable:$true] %s916_s1 }
 0x7c2   :  { %900 = vmatpush.msra.mxu2 %v46_v62 }
 0x7fb   :  { %v439_v24 = vpop.permute.xlu2 %438 }
 0x7fc   :  { %v445_v4 = vsel %vm444_vm12, %v443_v3, %v439_v24 }
 0x7fd   :  { %957 = vmatmul.msk.f32.vlgmr.msra.gmra.mxu3 %vm54_vm0, %v445_v4 }
 0x81f   :  { %v514_v5 = vpop.f32.mrf.mxu0 }
 0x828   :  { %v656_v6 = vpop.f32.mrf.mxu0 }
 0x829   :  { %735 = vrot.lane.b32.xlu0 %v656_v6, %s1101_s24 }
 0x82b   :  { %v585_v7 = vpop.f32.mrf.mxu1 }
 0x82c   :  { %731 = vrot.lane.b32.xlu1 %v585_v7, %s1099_s22 }
 0x833   :  { %v727_v9 = vpop.f32.mrf.mxu1 }
 0x834   :  { %739 = vrot.lane.b32.xlu2 %v727_v9, %s1102_s4  ;;  %s918_s4 = sshll.u32 %s1457_s5, 4  ;;  %s919_s4 = int_to_ptr.hbm [resolvable:$true] %s918_s4 }
 0x880   :  { %v784_v36 = vpop.f32.mrf.mxu3 }
 0x881   :  { %v790_v12 = vadd.f32 %v784_v36, %v1141_v0 }
 0x883   :  { %v1379_v13 = vadd.f32 %v792_v11, %v790_v12 }
 0x885   :  { %v795_v38 = vsel %vm54_vm0, %v1379_v13, 0.0 }
 0x886   :  { %796 = vadd.xlane.f32.xlu1 %v795_v38 }
 0x88e   :  { %v740_v23 = vpop.permute.xlu2 %739 }
 0x89b   :  { %v736_v21 = vpop.permute.xlu0 %735 }
 0x89e   :  { %v732_v20 = vpop.permute.xlu1 %731 }
 0x89f   :  { %v742_v22 = vsel %vm148_vm5, %v514_v5, %v732_v20 }
 0x8a0   :  { %v743_v25 = vsel %vm442_vm11, %v742_v22, %v736_v21 }
 0x8a1   :  { %v744_v26 = vsel %vm444_vm12, %v743_v25, %v740_v23  ;;  %v877_v23 = vperm.slane %v1179_v28, 7 }
 0x8a2   :  { %958 = vmatmul.msk.f32.gmra.mxu3 %vm54_vm0, %v744_v26 }
 0x8f9   :  { %v797_v27 = vpop.xlane.xlu1 %796 }
 0x8fa   :  { %v801_v0 = vmul.f32 %v797_v27, %v1145_v8 }
 0x8fc   :  { %v803_v42 = vsub.f32 %v1379_v13, %v801_v0 }
 0x8fe   :  { %v805_v29 = vmul.f32 %v803_v42, %v803_v42 }
 0x900   :  { %v807_v10 = vsel %vm54_vm0, %v805_v29, 0.0 }
 0x901   :  { %808 = vadd.xlane.f32.xlu2 %v807_v10 }
 0x925   :  { %v787_v31 = vpop.f32.mrf.mxu3 }
 0x926   :  { %v791_v40 = vadd.f32 %v787_v31, %v1233_v60  ;;  %v41_v60 = vld [vmem:[%s1454_s2 + $0x18] sm:$0xff] }
 0x927   :  { %866 = vmatpush.msrb.mxu0 %v41_v60 }
 0x928   :  { %v1391_v32 = vadd.f32 %v792_v11, %v791_v40 }
 0x929   :  { %867 = vmatpush.msrb.mxu0 %v39_v15 }
 0x92a   :  { %v798_v34 = vsel %vm54_vm0, %v1391_v32, 0.0 }
 0x92b   :  { %799 = vadd.xlane.f32.xlu0 %v798_v34 }
 0x974   :  { %v809_v16 = vpop.xlane.xlu2 %808 }
 0x975   :  { %v813_v17 = vmul.f32 %v809_v16, %v1145_v8 }
 0x977   :  { %v815_v18 = vadd.f32 1e-12, %v813_v17 }
 0x979   :  { %1030 = vrsqrt.f32 %v815_v18  ;;  %vm823_vm14 = vweird.f32 %v815_v18 }
 0x97f   :  { %v1031_v19 = vpop.eup %1030 }
 0x980   :  { %v818_v37 = vmul.f32 %v1031_v19, %v815_v18  ;;  %vm824_vm13 = vweird.f32 %v1031_v19 }
 0x981   :  { %vm825_vm15 = vmor %vm823_vm14, %vm824_vm13 }
 0x982   :  { %v819_v39 = vmul.f32 %v1031_v19, %v818_v37 }
 0x984   :  { %v820_v30 = vmul.f32 0.5, %v819_v39 }
 0x986   :  { %v821_v43 = vsub.f32 1.5, %v820_v30 }
 0x988   :  { %v822_v45 = vmul.f32 %v1031_v19, %v821_v43 }
 0x98a   :  { %v826_v48 = vsel %vm825_vm15, %v1031_v19, %v822_v45 }
 0x98b   :  { %v837_v49 = vmul.f32 %v826_v48, %v803_v42 }
 0x98d   :  { %v840_v52 = vmul.f32 %v839_v46, %v837_v49 }
 0x98f   :  { %v843_v53 = vadd.f32 %v842_v50, %v840_v52 }
 0x991   :  { %959 = vmatmul.msk.f32.vlgmr.msrb.gmra.mxu0 %vm54_vm0, %v843_v53 }
 0x99e   :  { %v800_v54 = vpop.xlane.xlu0 %799 }
 0x99f   :  { %v802_v55 = vmul.f32 %v800_v54, %v1145_v8 }
 0x9a1   :  { %v804_v57 = vsub.f32 %v1391_v32, %v802_v55 }
 0x9a3   :  { %v806_v56 = vmul.f32 %v804_v57, %v804_v57 }
 0x9a5   :  { %v810_v58 = vsel %vm54_vm0, %v806_v56, 0.0 }
 0x9a6   :  { %811 = vadd.xlane.f32.xlu1 %v810_v58 }
 0xa0e   :  { %v869_v1 = vpop.f32.mrf.mxu0 }
 0xa0f   :  { %v870_v2 = vadd.f32 %v869_v1, %v845_v63 }
 0xa11   :  { %v875_v3 = vmax.f32 %v870_v2, 0.0 }
 0xa13   :  { %961 = vmatmul.msk.f32.vlgmr.msra.gmra.mxu2 %vm878_vm1, %v875_v3 }
 0xa19   :  { %v812_v24 = vpop.xlane.xlu1 %811 }
 0xa1a   :  { %v814_v4 = vmul.f32 %v812_v24, %v1145_v8 }
 0xa1c   :  { %v816_v5 = vadd.f32 1e-12, %v814_v4 }
 0xa1e   :  { %1032 = vrsqrt.f32 %v816_v5  ;;  %vm833_vm3 = vweird.f32 %v816_v5 }
 0xa24   :  { %v1033_v6 = vpop.eup %1032 }
 0xa25   :  { %v828_v7 = vmul.f32 %v1033_v6, %v816_v5  ;;  %vm834_vm2 = vweird.f32 %v1033_v6 }
 0xa26   :  { %vm835_vm4 = vmor %vm833_vm3, %vm834_vm2 }
 0xa27   :  { %v829_v9 = vmul.f32 %v1033_v6, %v828_v7 }
 0xa29   :  { %v830_v11 = vmul.f32 0.5, %v829_v9 }
 0xa2b   :  { %v831_v36 = vsub.f32 1.5, %v830_v11 }
 0xa2d   :  { %v832_v12 = vmul.f32 %v1033_v6, %v831_v36 }
 0xa2f   :  { %v836_v38 = vsel %vm835_vm4, %v1033_v6, %v832_v12 }
 0xa30   :  { %v838_v20 = vmul.f32 %v836_v38, %v804_v57 }
 0xa32   :  { %v841_v21 = vmul.f32 %v839_v46, %v838_v20 }
 0xa34   :  { %v844_v22 = vadd.f32 %v842_v50, %v841_v21 }
 0xa36   :  { %960 = vmatmul.msk.f32.gmra.mxu0 %vm54_vm0, %v844_v22 }
 0xa96   :  { %v902_v8 = vpop.f32.mrf.mxu2 }
 0xa97   :  { %v903_v25 = vadd.f32 %v902_v8, %v877_v23 }
 0xa99   :  { %v908_v26 = vadd.f32 %v903_v25, %v1379_v13 }
 0xa9b   :  { %910 = vst.msk [vmem:[#allocation5] sm:$0xff] %vm54_vm0, %v908_v26 }
 0xab3   :  { %v872_v27 = vpop.f32.mrf.mxu0 }
 0xab4   :  { %v873_v0 = vadd.f32 %v872_v27, %v845_v63 }
 0xab6   :  { %v876_v42 = vmax.f32 %v873_v0, 0.0 }
 0xab8   :  { %962 = vmatmul.msk.f32.gmra.mxu2 %vm878_vm1, %v876_v42 }
 0xb3b   :  { %v905_v29 = vpop.f32.mrf.mxu2 }
 0xb3c   :  { %v906_v10 = vadd.f32 %v905_v29, %v877_v23 }
 0xb3e   :  { %v909_v28 = vadd.f32 %v906_v10, %v1391_v32 }
 0xb40   :  { %911 = vst.msk [vmem:[#allocation5 + $0x8] sm:$0xff] %vm54_vm0, %v909_v28 }
 0xb41   :  { %924 = dma.vmem_to_hbm [thread:$0]  %s917_s1, 256, %s919_s4, [#allocation4], %s1104_s25, %s1104_s25, %s1099_s22  }
 0xb42   :  { %1084 = dma.done.wait [#allocation4], 256  }
 0xb43   :  { %1085 = vsyncadd [#allocation4], 4294967040 }
 0xb44   :  { %929 = vsyncpa [#allocation3], 1 }
 0xb45   :  { %930 = vsyncpa [#allocation4], 1 }

</bundles_post_ra>
